<compile_context>
chip_gen: v5e
topology: v5e:2x2
jax: 0.10.0
libtpu: 0.0.40
codegen_flags: <defaults>
</compile_context>

<pallas_src>
import jax
import jax.numpy as jnp
from jax.experimental import pallas as pl
from jax.experimental.pallas import tpu as pltpu


def fishnet_kernel(x_ref, o_ref):
    x = x_ref[...]
    if x.dtype != jnp.float32:
        # Sub-32-bit inputs (bf16 etc.) must be computed in f32 (esp. v5e).
        x = x.astype(jnp.float32)
    # softmax(2x) == exp(2*(x - max(x))) / sum(...)  -> fuse the doubling,
    # never materialize z = x + x.
    m = jnp.max(x, axis=-1, keepdims=True)
    e = jnp.exp((x - m) * 2.0)
    s = jnp.sum(e, axis=-1, keepdims=True)
    # approx=True -> EUP vrcp, separate VLIW slot from the VPU multiply.
    o_ref[...] = (e * pl.reciprocal(s, approx=True)).astype(o_ref.dtype)


def _round_up(v, m):
    return ((v + m - 1) // m) * m


def _choose_row_tile(M, N, dtype, target_block_bytes=2 << 20, min_grid_steps=8):
    """Pick a row tile giving ~target_block_bytes per input block.

    - rows are a multiple of the sublane packing (8 for f32, 16 for bf16, ...)
    - rows are capped so a large batch still yields >= min_grid_steps grid
      steps (keeps both v7x TensorCores fed via the 'parallel' axis).
    """
    itemsize = jnp.dtype(dtype).itemsize
    sub = max(8, 32 // max(1, itemsize))          # (8,128) f32 / (16,128) bf16
    m_padded = _round_up(M, sub)
    rows = max(sub, (target_block_bytes // (itemsize * N)) // sub * sub)
    rows = min(rows, max(sub, _round_up(pl.cdiv(m_padded, min_grid_steps), sub)))
    return min(rows, m_padded)


def fishnet_forward(x, *, target_block_bytes=2 << 20,
                    vmem_limit_bytes=48 * 1024 * 1024):
    """x: [M, N] float array.  Returns softmax(x + x, axis=-1)."""
    M, N = x.shape
    # TODO(synk): for very wide N (block > VMEM budget) switch to an online
    # softmax with a column grid axis marked "arbitrary" (P3 pattern).
    row_tile = _choose_row_tile(M, N, x.dtype, target_block_bytes)
    grid = (pl.cdiv(M, row_tile),)
    return pl.pallas_call(
        fishnet_kernel,
        out_shape=jax.ShapeDtypeStruct((M, N), x.dtype),
        grid_spec=pltpu.PrefetchScalarGridSpec(
            num_scalar_prefetch=0,
            grid=grid,
            in_specs=[pl.BlockSpec((row_tile, N), lambda i: (i, 0))],
            out_specs=pl.BlockSpec((row_tile, N), lambda i: (i, 0)),
        ),
        compiler_params=pltpu.CompilerParams(
            dimension_semantics=("parallel",),
            vmem_limit_bytes=vmem_limit_bytes,
        ),
    )(x)


if __name__ == "__main__":
    key = jax.random.PRNGKey(0)

    # Small shapes consistent with the 2-D forward.  M=12 is deliberately not
    # a multiple of the row tile to exercise the cdiv / partial-block path.
    for shape in [(12, 128), (16, 256)]:
        k, key = jax.random.split(key)
        x = jax.random.normal(k, shape, dtype=jnp.float32)

        out = jax.block_until_ready(fishnet_forward(x))
        ref = jax.nn.softmax(x + x, axis=-1)

        assert out.shape == x.shape
        # Tolerance accounts for the approximate (EUP) reciprocal in the
        # softmax denominator (~1e-4-level relative error on probabilities).
        assert jnp.allclose(out, ref, atol=1e-3, rtol=1e-3), (
            f"mismatch for shape {shape}")

    print("KERNEL_OK")
</pallas_src>

<mosaic_0001>
module attributes {stable_mosaic.version = 11 : i64} {
  func.func @fishnet_kernel(%arg0: i32, %arg1: memref<8x128xf32, #tpu.memory_space<vmem>>, %arg2: memref<8x128xf32, #tpu.memory_space<vmem>>) attributes {dimension_semantics = [#tpu.dimension_semantics<parallel>], iteration_bounds = array<i64: 2>, scalar_prefetch = 0 : i64, scratch_operands = 0 : i64, tpu.core_type = #tpu.core_type<tc>, window_params = [{transform_indices = @transform_0, window_bounds = array<i64: 8, 128>}, {transform_indices = @transform_1, window_bounds = array<i64: 8, 128>}]} {
    %c0 = arith.constant 0 : index
    %c0_0 = arith.constant 0 : index
    %0 = vector.load %arg1[%c0, %c0_0] : memref<8x128xf32, #tpu.memory_space<vmem>>, vector<8x128xf32>
    %cst = arith.constant dense<0xFF800000> : vector<8xf32>
    %1 = vector.multi_reduction <maximumf>, %0, %cst [1] : vector<8x128xf32> to vector<8xf32>
    %2 = vector.shape_cast %1 : vector<8xf32> to vector<8x1xf32>
    %3 = vector.broadcast %2 : vector<8x1xf32> to vector<8x128xf32>
    %4 = arith.subf %0, %3 : vector<8x128xf32>
    %cst_1 = arith.constant 2.000000e+00 : f32
    %5 = vector.broadcast %cst_1 : f32 to vector<8x128xf32>
    %6 = arith.mulf %4, %5 : vector<8x128xf32>
    %7 = math.exp %6 : vector<8x128xf32>
    %cst_2 = arith.constant dense<0.000000e+00> : vector<8xf32>
    %8 = vector.multi_reduction <add>, %7, %cst_2 [1] : vector<8x128xf32> to vector<8xf32>
    %9 = vector.shape_cast %8 : vector<8xf32> to vector<8x1xf32>
    %10 = tpu.reciprocal %9 {approx = true} : vector<8x1xf32> -> vector<8x1xf32>
    %11 = vector.broadcast %10 : vector<8x1xf32> to vector<8x128xf32>
    %12 = arith.mulf %7, %11 : vector<8x128xf32>
    %c0_3 = arith.constant 0 : index
    %c0_4 = arith.constant 0 : index
    %13 = vector.load %arg2[%c0_3, %c0_4] : memref<8x128xf32, #tpu.memory_space<vmem>>, vector<8x128xf32>
    tpu.vector_store %arg2[%c0_3, %c0_4], %12 {strides = array<i32>} : memref<8x128xf32, #tpu.memory_space<vmem>>, vector<8x128xf32>,
    return
  }
  func.func @transform_0(%arg0: i32) -> (i32, i32) {
    %c0_i32 = arith.constant 0 : i32
    %c0_i32_0 = arith.constant 0 : i32
    return %arg0, %c0_i32 : i32, i32
  }
  func.func @transform_1(%arg0: i32) -> (i32, i32) {
    %c0_i32 = arith.constant 0 : i32
    %c0_i32_0 = arith.constant 0 : i32
    return %arg0, %c0_i32 : i32, i32
  }
}

</mosaic_0001>

<bundles_post_ra>
// kernel: tpu_custom_call.1
= control target key start
LH: loop header
LB: loop body
LE: loop exit
PB: predicated region body
PF: predicated region fallthrough
CT: control target
= control target key end

     0   :  { %6 = vsyncpa [#allocation3], 0  ;;  %s529_s0 = inlined_call_operand.hbm [shape: f32[12,128], index: 0, kind: input, shape index: {}]   ;;  %s530_s1 = inlined_call_operand.hbm [shape: f32[12,128], index: 1, kind: output, shape index: {}]  }
   0x1   :  { %8 = vsyncpa [#allocation3 + $0x1], 0 }
   0x2   :  { %9 = vsyncpa [#allocation4], 0 }
   0x3   :  { %11 = vsyncpa [#allocation4 + $0x1], 0  ;;  %s402_s6 = smov 0   ;;  %s404_s7 = smov 0  }
   0x4   :  { %s406_s8 = smov 0   ;;  %s408_s9 = smov 0  }
   0x5 LB: > { %s423_s10 = sadd.s32 4294967295, %s390_s9   ;;  %s232_s11 = sadd.s32 4294967294, %s390_s9   ;;  %s390_s9 = sphi %s408_s9, %s540_s9   ;;  %s386_s8 = sphi %s406_s8, %s539_s8   ;;  %s382_s7 = sphi %s404_s7, %s538_s7   ;;  %s378_s6 = sphi %s402_s6, %s537_s6  }
   0x6   : > { %s427_s12 = sadd.s32 1, %s390_s9   ;;  %s24_s13 = sadd.s32 1, %s386_s8 }
   0x7   : > { %s21_s14 = ssub.s32 %s390_s9, %s427_s12  ;;  %p31_p0 = scmp.ne.s32.totalorder %s386_s8, %s382_s7 }
   0x8   : > { %p22_p1 = scmp.eq.s32.totalorder %s21_s14, 0  ;;  %p32_p2 = scmp.eq.s32.totalorder %s390_s9, 0 }
   0x9   : > { %p37_p3 = scmp.ne.s32.totalorder %s382_s7, %s378_s6  ;;  %p38_p4 = scmp.eq.s32.totalorder %s423_s10, 0 }
   0xa   : > { %s439_s15 = scalar_select %p22_p1, %s386_s8, %s24_s13  }
   0xb   : > { %p441_p5 = por %p32_p2, %p31_p0  ;;  %p445_p6 = por %p38_p4, %p37_p3 }
   0xc   : > { %p61_p7 = scmp.eq.s32.totalorder %s423_s10, 1  ;;  %p67_p8 = scmp.eq.s32.totalorder %s232_s11, 1 }
   0xd   : > { %p256_p10 = scmp.lt.s32.totalorder %s390_s9, 2  ;;  %s87_s20 = sand.u32 1, %s386_s8  }
   0xe   : > { %p452_p11 = por %p61_p7, %p31_p0  ;;  %p456_p12 = por %p67_p8, %p37_p3 }
   0xf   : > { %s236_s21 = sshll.u32 %s390_s9, 3  ;;  %s235_s22 = sshll.u32 %s87_s20, 3 }
  0x10   : > { %s95_s25 = scalar_lea.hbm %s529_s0, %s236_s21  ;;  %s91_s27 = scalar_lea.vmem [#allocation2], %s235_s22 }
  0x11   : > { %s97_s26 = sshll.u32 %s95_s25, 4  ;;  %s99_s28 = sshll.u32 %s91_s27, 4  ;;  %s98_s26 = int_to_ptr.hbm [resolvable:$true] %s97_s26  ;;  %s100_s28 = int_to_ptr.vmem [resolvable:$true] %s99_s28 }
  0x12   : > { %p467_p13 = pnand %p256_p10, %p441_p5  ;;  %p237_p0 = scmp.ge.s32.totalorder %s390_s9, 1 }
  0x13   : > { %p104_p1 = scmp.lt.s32.totalorder %s390_s9, 3  ;;  %s88_s30 = scalar_lea.sflag [#allocation3], %s87_s20 }
  0x14   : > { %s294_s2 = sshra.s32 %s98_s26, 4  ;;  %p298_p3 = pneg %p467_p13  ;;  %s295_s2 = int_to_ptr.hbm [resolvable:$true] %s294_s2 }
  0x15   : > { %s296_s3 = scalar_lea.hbm %s295_s2, 8  ;;  %s301_s11 = scalar_lea.hbm %s529_s0, 16 }
  0x16   : > { %p297_p2 = scmp.ne.s32.totalorder %s295_s2, %s296_s3  ;;  %p302_p5 = scmp.lt.s32.totalorder %s295_s2, %s529_s0 }
  0x17   : > { %p303_p8 = scmp.lt.s32.totalorder %s301_s11, %s296_s3 }
  0x18   : > { %p299_p4 = pnand %p298_p3, %p297_p2 }
  0x19   : > { %p304_p10 = por %p303_p8, %p302_p5 }
  0x1a   : > { %p300_p7 = pneg %p299_p4 }
  0x1c   : > { %p305_p9 = pnand %p304_p10, %p300_p7 }
  0x1e   : > { %308 = shalt.err (!%p305_p9)
}
  0x1f   : > { %251 = dma.hbm_to_vmem [thread:$0]  (!%p467_p13), %s98_s26, 128, %s100_s28, %s88_s30  }
  0x20   : > { %p105_p2 = pnand %p237_p0, %p104_p1 }
  0x21   : > { %s488_s16 = sand.u32 (!%p105_p2), 1, %s382_s7  }
  0x22   : > { %108 = sbr.rel (%p105_p2) target bundleno = 298 (0x12a), region = 24  ;;  %s238_s20 = sshll.u32 (!%p105_p2), %s488_s16, 3 }
  0x23   : > { %s111_s21 = scalar_lea.sflag (!%p105_p2), [#allocation3], %s488_s16  ;;  %s114_s22 = scalar_lea.vmem (!%p105_p2), [#allocation2], %s238_s20 }
  0x27   : > { %369 = dma.done.wait (%p445_p6), %s111_s21, 128  }
  0x28   : > { %371 = vsyncadd (%p445_p6), %s111_s21, 4294967168  ;;  %v134_v0 = vld [vmem:[%s114_s22] sm:$0xff]  ;;  %s241_s23 = sshll.u32 %s423_s10, 3  ;;  %s133_s26 = scalar_lea.vmem [#allocation5], %s238_s20 }
  0x29   : > { %135 = vmax.xlane.f32.xlu0 %v134_v0  ;;  %s157_s17 = scalar_lea.hbm %s530_s1, %s241_s23  ;;  %s159_s27 = sshll.u32 %s133_s26, 4  ;;  %s160_s27 = int_to_ptr.vmem [resolvable:$true] %s159_s27 }
  0x2a   : > { %s161_s28 = sshll.u32 %s157_s17, 4  ;;  %s147_s29 = scalar_lea.sflag [#allocation4], %s488_s16  ;;  %s162_s28 = int_to_ptr.hbm [resolvable:$true] %s161_s28 }
  0x2b   : > { %s338_s30 = sshra.s32 %s162_s28, 4  ;;  %s344_s4 = scalar_lea.hbm %s530_s1, 16  ;;  %s339_s30 = int_to_ptr.hbm [resolvable:$true] %s338_s30 }
  0x2c   : > { %s340_s2 = scalar_lea.hbm %s339_s30, 8  ;;  %p345_p0 = scmp.lt.s32.totalorder %s339_s30, %s530_s1 }
  0x2d   : > { %p341_p6 = scmp.ne.s32.totalorder %s339_s30, %s340_s2  ;;  %p346_p1 = scmp.lt.s32.totalorder %s344_s4, %s340_s2 }
  0x2f   : > { %p342_p9 = pnand %p341_p6, %p452_p11  ;;  %p347_p3 = por %p346_p1, %p345_p0 }
  0x31   : > { %p343_p13 = pneg %p342_p9 }
  0x33   : > { %p348_p4 = pnand %p347_p3, %p343_p13 }
  0x9c   : > { %v136_v1 = vpop.xlane.xlu0 %135 }
  0x9d   : > { %v137_v2 = vsub.f32 %v134_v0, %v136_v1 }
  0x9f   : > { %v138_v3 = vmul.f32 2.0, %v137_v2 }
  0xa1   : > { %v139_v4 = vmul.f32 1.442695, %v138_v3 }
  0xa3   : > { %290 = vpow2.f32 %v139_v4 }
  0xa9   : > { %v291_v5 = vpop.eup %290 }
  0xaa   : > { %141 = vadd.xlane.f32.xlu0 %v291_v5 }
 0x11d   : > { %v142_v6 = vpop.xlane.xlu0 %141 }
 0x11e   : > { %292 = vrcp.f32 %v142_v6 }
 0x124   : > { %v293_v7 = vpop.eup %292 }
 0x125   : > { %v144_v8 = vmul.f32 %v293_v7, %v291_v5 }
 0x127   : > { %145 = vst [vmem:[%s133_s26] sm:$0xff] %v144_v8 }
 0x128   : > { %351 = shalt.err (!%p348_p4)
}
 0x129   : > { %246 = dma.vmem_to_hbm [thread:$0]  (%p452_p11), %s160_s27, 128, %s162_s28, %s147_s29  }
 0x12a PF: > { %s173_s13 = sand.u32 1, %s378_s6   ;;  %p536_p7 = scmp.ge.s32.totalorder %s390_s9, 2 }
 0x12b   : > { %s174_s14 = scalar_lea.sflag [#allocation4], %s173_s13 }
 0x12c   : > { %p253_p5 = pnand %p536_p7, %p456_p12 }
 0x12e   : > { %p254_p8 = pneg %p253_p5 }
 0x130   : > { %373 = dma.done.wait (%p254_p8), %s174_s14, 128  }
 0x131   : > { %375 = vsyncadd (%p254_p8), %s174_s14, 4294967168  ;;  %p14_p10 = scmp.ge.s32.totalorder %s427_s12, 4   ;;  %s537_s6 = smov %s382_s7 }
 0x132   : > { %s538_s7 = smov %s386_s8  ;;  %s539_s8 = smov %s439_s15 }
 0x133   : > { %s540_s9 = smov %s427_s12  ;;  %16 = sbr.rel (!%p14_p10) target bundleno = 5 (0x5), region = 69 }
 0x138   :  { %180 = vsyncpa [#allocation3], 1 }
 0x139   :  { %182 = vsyncpa [#allocation3 + $0x1], 1 }
 0x13a   :  { %183 = vsyncpa [#allocation4], 1 }
 0x13b   :  { %185 = vsyncpa [#allocation4 + $0x1], 1 }

</bundles_post_ra>
